<compile_context>
chip_gen: v5e
topology: v5e:2x2
jax: 0.10.0
libtpu: 0.0.40
codegen_flags: <defaults>
</compile_context>

<pallas_src>
import jax
import jax.numpy as jnp
from jax.experimental import pallas as pl
from jax.experimental.pallas import tpu as pltpu

_LANE = 128                              # vreg lane width: last-dim tiling quantum
_VMEM_LIMIT_BYTES = 48 * 1024 * 1024     # explicit scoped-VMEM budget (fits v7x 64 MiB physical)
_VMEM_HEADROOM = 4 * 1024 * 1024


def _round_up(x, k):
    return -(-x // k) * k


def optlayer_kernel(xb_ref, w_ref, out_ref):
    """Single fused MXU pass: out = [x0 | b | 0] @ [[W1], [W2], [0]]  (== z*)."""
    out_ref[...] = jnp.dot(
        xb_ref[...], w_ref[...], preferred_element_type=jnp.float32
    ).astype(out_ref.dtype)


def make_optlayer_weights(A, *, compute_dtype=jnp.bfloat16):
    """One-time offline constant folding of the layer's fixed problem data.

    Returns the fused, lane-padded weight Wp of shape (Kp, Np) with
      Wp[:n+m, :n] = [[I - A^T M A], [M A]],  M = (A A^T)^{-1}  (Cholesky solve),
    so that z* = [x0 | b] @ Wp[:n+m, :n].
    """
    m, n = A.shape
    with jax.default_matmul_precision("float32"):
        AAt = A @ A.T                                     # SPD (A full row rank)
        L = jnp.linalg.cholesky(AAt)
        MA = jax.scipy.linalg.cho_solve((L, True), A)     # (m, n) = M A
        W1 = jnp.eye(n, dtype=A.dtype) - A.T @ MA         # (n, n)
    W = jnp.concatenate([W1, MA], axis=0)                 # (n+m, n)
    Kp = _round_up(n + m, _LANE)                          # pad K to lane multiple
    Np = _round_up(n, _LANE)                              # pad N (lane-dense output)
    Wp = jnp.zeros((Kp, Np), dtype=compute_dtype)
    Wp = Wp.at[: n + m, :n].set(W.astype(compute_dtype))
    return Wp


def _pick_tb(B, Kp, Np, act_bytes, sublane):
    """Largest batch tile that fits the VMEM budget; >=2 grid steps when the
    batch allows it (so "parallel" can shard across both v7x TensorCores)."""
    # TODO(synk): weights larger than the VMEM budget would need an extra K/N grid axis.
    weight_bytes = 2 * Kp * Np * act_bytes          # worst case: double-buffered weight
    per_row = 2 * Kp * act_bytes + 2 * Np * 4       # double-buffered act tile + f32 out tile
    budget = _VMEM_LIMIT_BYTES - _VMEM_HEADROOM - weight_bytes
    tb_cap = max(sublane, (budget // per_row) // sublane * sublane)
    half = _round_up(max(-(-B // 2), sublane), sublane)
    return max(sublane, min(tb_cap, half))


def _build_call(B_pad, Kp, Np, tb, act_bytes, weight_buffer_count):
    grid = (B_pad // tb,)
    w_spec_kwargs = {}
    if weight_buffer_count is not None:
        # Constant index_map -> the fused weight is DMA'd once; single-buffering it
        # halves its VMEM footprint (matters on v7x's 64 MiB VMEM).
        w_spec_kwargs["pipeline_mode"] = pl.Buffered(weight_buffer_count)
    cost = pl.CostEstimate(
        flops=2 * B_pad * Kp * Np,
        transcendentals=0,
        bytes_accessed=B_pad * Kp * act_bytes + Kp * Np * act_bytes + B_pad * Np * 4,
    )
    return pl.pallas_call(
        optlayer_kernel,
        out_shape=jax.ShapeDtypeStruct((B_pad, Np), jnp.float32),
        grid_spec=pltpu.PrefetchScalarGridSpec(
            num_scalar_prefetch=0,
            grid=grid,
            in_specs=[
                pl.BlockSpec((tb, Kp), lambda i: (i, 0)),                    # activations, pipelined
                pl.BlockSpec((Kp, Np), lambda i: (0, 0), **w_spec_kwargs),   # fused weight, resident
            ],
            out_specs=pl.BlockSpec((tb, Np), lambda i: (i, 0)),              # lane-dense stores
        ),
        compiler_params=pltpu.CompilerParams(
            dimension_semantics=("parallel",),   # shard batch tiles across TCs (v7x megacore)
            vmem_limit_bytes=_VMEM_LIMIT_BYTES,
        ),
        cost_estimate=cost,
    )


def optlayer_forward(x0, b, Wp, *, tb=None):
    """Batched OptLayer forward: returns z* per row, shape (B, n).

    Note: at tiny sizes (like the demo shapes below) fixed per-call / per-grid-step
    overhead dominates and a plain XLA jnp.dot is as fast; the Pallas path pays
    off once B*(n+m) is large enough to keep the DMA pipeline busy.
    """
    B, n = x0.shape
    m = b.shape[1]
    Kp, Np = Wp.shape
    compute_dtype = Wp.dtype
    act_bytes = jnp.dtype(compute_dtype).itemsize
    sublane = 16 if act_bytes == 2 else 8

    if tb is None:
        tb = _pick_tb(B, Kp, Np, act_bytes, sublane)
    tb = max(sublane, _round_up(tb, sublane))           # sublane-aligned batch tile
    B_pad = _round_up(max(B, tb), tb)                   # no divisibility assert: pad the batch

    # Fused, zero-padded activation slab [x0 | b | 0] in the compute dtype:
    # one K=(n+m) MXU pass instead of dot + dot + VPU add; padded rows/cols are zero.
    xb = jnp.zeros((B_pad, Kp), dtype=compute_dtype)
    xb = xb.at[:B, :n].set(x0.astype(compute_dtype))
    xb = xb.at[:B, n:n + m].set(b.astype(compute_dtype))

    out_pad, err = None, None
    # Prefer a single-buffered constant weight (v7x VMEM); fall back to the default
    # double-buffered spec if this jax version rejects Buffered(1) for pallas_call.
    for weight_buffer_count in (1, None):
        try:
            call = _build_call(B_pad, Kp, Np, tb, act_bytes, weight_buffer_count)
            out_pad = jax.block_until_ready(call(xb, Wp))
            break
        except Exception as e:  # noqa: BLE001 - lowering support is version-dependent
            err = e
    if out_pad is None:
        raise err
    return out_pad[:B, :n]


def optlayer_reference(x0, b, A):
    """Pure-JAX reference of the *full* module forward semantics:
    closed-form KKT solve + explicit KKT-residual correction (== 0 analytically)."""
    with jax.default_matmul_precision("float32"):
        AAt = A @ A.T
        r = x0 @ A.T - b                     # (B, m)
        w = jnp.linalg.solve(AAt, r.T).T     # (B, m)  rows of M r
        z = x0 - w @ A                       # (B, n)  z*
        nu = 2.0 * w                         # (B, m)  equality duals
        dz = 2.0 * (z - x0) + nu @ A         # KKT stationarity residual (== 0)
    return z - dz                            # mat(y)[0]


if __name__ == "__main__":
    # Small shapes consistent with the module: batch=8, n=32 variables, m=8 constraints.
    B, n, m = 8, 32, 8

    key = jax.random.PRNGKey(0)
    k_a, k_x0, k_b = jax.random.split(key, 3)

    A = jax.random.normal(k_a, (m, n), dtype=jnp.float32)      # fixed problem data
    Wp = make_optlayer_weights(A)                              # folded + padded, bf16

    x0 = jax.random.normal(k_x0, (B, n), dtype=jnp.float32)    # batched parameters
    b = jax.random.normal(k_b, (B, m), dtype=jnp.float32)

    out = optlayer_forward(x0, b, Wp)
    out = jax.block_until_ready(out)
    assert out.shape == (B, n)

    # (1) Tight check against a reference using the same bf16-quantized fused weight.
    xb_q = jnp.concatenate([x0, b], axis=1).astype(jnp.bfloat16).astype(jnp.float32)
    ref_matched = xb_q @ Wp.astype(jnp.float32)[: n + m, :n]
    assert jnp.allclose(out, ref_matched, atol=2e-3, rtol=2e-3), "mismatch vs quantized ref"

    # (2) Loose check against the exact full-module semantics (bf16-limited accuracy).
    ref_exact = optlayer_reference(x0, b, A)
    assert jnp.allclose(out, ref_exact, atol=5e-2, rtol=5e-2), "mismatch vs exact ref"

    print("KERNEL_OK")
</pallas_src>

<mosaic_0001>
module attributes {stable_mosaic.version = 11 : i64} {
  func.func @optlayer_kernel(%arg0: i32, %arg1: memref<16x128xbf16, #tpu.memory_space<vmem>>, %arg2: memref<128x128xbf16, #tpu.memory_space<vmem>>, %arg3: memref<16x128xf32, #tpu.memory_space<vmem>>) attributes {dimension_semantics = [#tpu.dimension_semantics<parallel>], iteration_bounds = array<i64: 1>, scalar_prefetch = 0 : i64, scratch_operands = 0 : i64, tpu.core_type = #tpu.core_type<tc>, window_params = [{transform_indices = @transform_0, window_bounds = array<i64: 16, 128>}, {pipeline_mode = #tpu.pipeline_mode<synchronous>, transform_indices = @transform_1, window_bounds = array<i64: 128, 128>}, {transform_indices = @transform_2, window_bounds = array<i64: 16, 128>}]} {
    %c0 = arith.constant 0 : index
    %c0_0 = arith.constant 0 : index
    %0 = vector.load %arg1[%c0, %c0_0] : memref<16x128xbf16, #tpu.memory_space<vmem>>, vector<16x128xbf16>
    %c0_1 = arith.constant 0 : index
    %c0_2 = arith.constant 0 : index
    %1 = vector.load %arg2[%c0_1, %c0_2] : memref<128x128xbf16, #tpu.memory_space<vmem>>, vector<128x128xbf16>
    %cst = arith.constant dense<0.000000e+00> : vector<16x128xf32>
    %2 = tpu.matmul %0, %1, %cst {dimension_numbers = #tpu.dot_dimension_numbers<[1], [0], [0], [1], [0, 0, 1, 1], [], []>} : vector<16x128xbf16>, vector<128x128xbf16>, vector<16x128xf32> -> vector<16x128xf32>
    %c0_3 = arith.constant 0 : index
    %c0_4 = arith.constant 0 : index
    %3 = vector.load %arg3[%c0_3, %c0_4] : memref<16x128xf32, #tpu.memory_space<vmem>>, vector<16x128xf32>
    tpu.vector_store %arg3[%c0_3, %c0_4], %2 {strides = array<i32>} : memref<16x128xf32, #tpu.memory_space<vmem>>, vector<16x128xf32>,
    return
  }
  func.func @transform_0(%arg0: i32) -> (i32, i32) {
    %c0_i32 = arith.constant 0 : i32
    %c0_i32_0 = arith.constant 0 : i32
    return %arg0, %c0_i32 : i32, i32
  }
  func.func @transform_1(%arg0: i32) -> (i32, i32) {
    %c0_i32 = arith.constant 0 : i32
    %c0_i32_0 = arith.constant 0 : i32
    %c0_i32_1 = arith.constant 0 : i32
    return %c0_i32, %c0_i32_0 : i32, i32
  }
  func.func @transform_2(%arg0: i32) -> (i32, i32) {
    %c0_i32 = arith.constant 0 : i32
    %c0_i32_0 = arith.constant 0 : i32
    return %arg0, %c0_i32 : i32, i32
  }
}

module attributes {stable_mosaic.version = 11 : i64} {
  func.func @optlayer_kernel(%arg0: i32, %arg1: memref<16x128xbf16, #tpu.memory_space<vmem>>, %arg2: memref<128x128xbf16, #tpu.memory_space<vmem>>, %arg3: memref<16x128xf32, #tpu.memory_space<vmem>>) attributes {dimension_semantics = [#tpu.dimension_semantics<parallel>], iteration_bounds = array<i64: 1>, scalar_prefetch = 0 : i64, scratch_operands = 0 : i64, tpu.core_type = #tpu.core_type<tc>, window_params = [{transform_indices = @transform_0, window_bounds = array<i64: 16, 128>}, {pipeline_mode = #tpu.pipeline_mode<synchronous>, transform_indices = @transform_1, window_bounds = array<i64: 128, 128>}, {transform_indices = @transform_2, window_bounds = array<i64: 16, 128>}]} {
    %c0 = arith.constant 0 : index
    %c0_0 = arith.constant 0 : index
    %0 = vector.load %arg1[%c0, %c0_0] : memref<16x128xbf16, #tpu.memory_space<vmem>>, vector<16x128xbf16>
    %c0_1 = arith.constant 0 : index
    %c0_2 = arith.constant 0 : index
    %1 = vector.load %arg2[%c0_1, %c0_2] : memref<128x128xbf16, #tpu.memory_space<vmem>>, vector<128x128xbf16>
    %cst = arith.constant dense<0.000000e+00> : vector<16x128xf32>
    %2 = tpu.matmul %0, %1, %cst {dimension_numbers = #tpu.dot_dimension_numbers<[1], [0], [0], [1], [0, 0, 1, 1], [], []>} : vector<16x128xbf16>, vector<128x128xbf16>, vector<16x128xf32> -> vector<16x128xf32>
    %c0_3 = arith.constant 0 : index
    %c0_4 = arith.constant 0 : index
    %3 = vector.load %arg3[%c0_3, %c0_4] : memref<16x128xf32, #tpu.memory_space<vmem>>, vector<16x128xf32>
    tpu.vector_store %arg3[%c0_3, %c0_4], %2 {strides = array<i32>} : memref<16x128xf32, #tpu.memory_space<vmem>>, vector<16x128xf32>,
    return
  }
  func.func @transform_0(%arg0: i32) -> (i32, i32) {
    %c0_i32 = arith.constant 0 : i32
    %c0_i32_0 = arith.constant 0 : i32
    return %arg0, %c0_i32 : i32, i32
  }
  func.func @transform_1(%arg0: i32) -> (i32, i32) {
    %c0_i32 = arith.constant 0 : i32
    %c0_i32_0 = arith.constant 0 : i32
    %c0_i32_1 = arith.constant 0 : i32
    return %c0_i32, %c0_i32_0 : i32, i32
  }
  func.func @transform_2(%arg0: i32) -> (i32, i32) {
    %c0_i32 = arith.constant 0 : i32
    %c0_i32_0 = arith.constant 0 : i32
    return %arg0, %c0_i32 : i32, i32
  }
}

</mosaic_0001>

<bundles_post_ra>
// kernel: tpu_custom_call.1
= control target key start
LH: loop header
LB: loop body
LE: loop exit
PB: predicated region body
PF: predicated region fallthrough
CT: control target
= control target key end

     0   :  { %7 = vsyncpa [#allocation3], 0  ;;  %s313_s0 = inlined_call_operand.hbm [shape: bf16[16,128], index: 0, kind: input, shape index: {}]   ;;  %s314_s1 = inlined_call_operand.hbm [shape: bf16[128,128], index: 1, kind: input, shape index: {}]   ;;  %s315_s2 = inlined_call_operand.hbm [shape: f32[16,128], index: 2, kind: output, shape index: {}]  }
   0x1   :  { %8 = vsyncpa [#allocation6], 0 }
   0x2   :  { %9 = vsyncpa [#allocation4], 0  ;;  %s14_s11 = sshll.u32 %s313_s0, 4  ;;  %s282_s12 = smov [#allocation2]   ;;  %s15_s11 = int_to_ptr.hbm [resolvable:$true] %s14_s11 }
   0x3   :  { %s16_s13 = sshll.u32 %s282_s12, 4  ;;  %s27_s16 = sshll.u32 %s314_s1, 4  ;;  %s17_s13 = int_to_ptr.vmem [resolvable:$true] %s16_s13  ;;  %s28_s16 = int_to_ptr.hbm [resolvable:$true] %s27_s16 }
   0x4   :  { %s283_s17 = smov 64   ;;  %s284_s18 = smov 4  }
   0x5   :  { %22 = dma.hbm_to_vmem [thread:$0]  %s15_s11, 128, %s17_s13, [#allocation3], %s283_s17, %s283_s17, %s284_s18  }
   0x6   :  { %s285_s19 = smov [#allocation5]  }
   0x7   :  { %s29_s20 = sshll.u32 %s285_s19, 4  ;;  %s30_s20 = int_to_ptr.vmem [resolvable:$true] %s29_s20 }
   0x8   :  { %35 = dma.hbm_to_vmem [thread:$0]  %s28_s16, 1024, %s30_s20, [#allocation6], %s283_s17, %s283_s17, %s284_s18  }
   0x9   :  { %276 = dma.done.wait [#allocation3], 128  }
   0xa   :  { %277 = vsyncadd [#allocation3], 4294967168 }
   0xb   :  { %278 = dma.done.wait [#allocation6], 1024  }
   0xc   :  { %279 = vsyncadd [#allocation6], 4294966272  ;;  %v196_v0 = vld [vmem:[#allocation5 + $0x38] sm:$0xff]  ;;  %v195_v1 = vld [vmem:[#allocation5 + $0x30] sm:$0xff]  ;;  %s286_s0 = smov [#allocation7]   ;;  %s138_s23 = sshll.u32 %s315_s2, 4  ;;  %s139_s23 = int_to_ptr.hbm [resolvable:$true] %s138_s23 }
   0xd   :  { %116 = vmatpush.bf16.msra.mxu0 %v196_v0  ;;  %v194_v2 = vld [vmem:[#allocation5 + $0x28] sm:$0xff]  ;;  %v193_v3 = vld [vmem:[#allocation5 + $0x20] sm:$0xff]  ;;  %v192_v4 = vld [vmem:[#allocation5 + $0x18] sm:$0xff]  ;;  %s136_s1 = sshll.u32 %s286_s0, 4  ;;  %s287_s24 = smov 128   ;;  %s137_s1 = int_to_ptr.vmem [resolvable:$true] %s136_s1 }
   0xe   :  { %v191_v5 = vld [vmem:[#allocation5 + $0x10] sm:$0xff]  ;;  %v190_v6 = vld [vmem:[#allocation5 + $0x8] sm:$0xff]  ;;  %v189_v7 = vld [vmem:[#allocation5] sm:$0xff]  ;;  %s288_s25 = smov 8  }
   0xf   :  { %v188_v8 = vld [vmem:[#allocation2] sm:$0xff] }
  0x11   :  { %117 = vmatpush.bf16.msra.mxu0 %v195_v1 }
  0x15   :  { %118 = vmatpush.bf16.msra.mxu0 %v194_v2 }
  0x19   :  { %119 = vmatpush.bf16.msra.mxu0 %v193_v3 }
  0x1d   :  { %120 = vmatpush.bf16.msra.mxu0 %v192_v4 }
  0x21   :  { %121 = vmatpush.bf16.msra.mxu0 %v191_v5 }
  0x25   :  { %122 = vmatpush.bf16.msra.mxu0 %v190_v6 }
  0x29   :  { %123 = vmatpush.bf16.msra.mxu0 %v189_v7 }
  0x2c   :  { %124 = vmatmul.bf16.vlgmr.msra.gmra.mxu0 %v188_v8 }
  0xa9   :  { %v125_v9 = vpop.f32.mrf.mxu0 }
  0xaa   :  { %130 = vst [vmem:[#allocation7] sm:$0xff] %v125_v9 }
  0xb1   :  { %v127_v10 = vpop.f32.mrf.mxu0 }
  0xb2   :  { %131 = vst [vmem:[#allocation7 + $0x8] sm:$0xff] %v127_v10 }
  0xb3   :  { %144 = dma.vmem_to_hbm [thread:$0]  %s137_s1, 256, %s139_s23, [#allocation4], %s287_s24, %s287_s24, %s288_s25  }
  0xb4   :  { %280 = dma.done.wait [#allocation4], 256  }
  0xb5   :  { %281 = vsyncadd [#allocation4], 4294967040 }
  0xb6   :  { %149 = vsyncpa [#allocation3], 1 }
  0xb7   :  { %150 = vsyncpa [#allocation6], 1 }
  0xb8   :  { %151 = vsyncpa [#allocation4], 1 }

// kernel: tpu_custom_call.1
= control target key start
LH: loop header
LB: loop body
LE: loop exit
PB: predicated region body
PF: predicated region fallthrough
CT: control target
= control target key end

     0   :  { %7 = vsyncpa [#allocation3], 0  ;;  %s313_s0 = inlined_call_operand.hbm [shape: bf16[16,128], index: 0, kind: input, shape index: {}]   ;;  %s314_s1 = inlined_call_operand.hbm [shape: bf16[128,128], index: 1, kind: input, shape index: {}]   ;;  %s315_s2 = inlined_call_operand.hbm [shape: f32[16,128], index: 2, kind: output, shape index: {}]  }
   0x1   :  { %8 = vsyncpa [#allocation6], 0 }
   0x2   :  { %9 = vsyncpa [#allocation4], 0  ;;  %s14_s11 = sshll.u32 %s313_s0, 4  ;;  %s282_s12 = smov [#allocation2]   ;;  %s15_s11 = int_to_ptr.hbm [resolvable:$true] %s14_s11 }
   0x3   :  { %s16_s13 = sshll.u32 %s282_s12, 4  ;;  %s27_s16 = sshll.u32 %s314_s1, 4  ;;  %s17_s13 = int_to_ptr.vmem [resolvable:$true] %s16_s13  ;;  %s28_s16 = int_to_ptr.hbm [resolvable:$true] %s27_s16 }
   0x4   :  { %s283_s17 = smov 64   ;;  %s284_s18 = smov 4  }
   0x5   :  { %22 = dma.hbm_to_vmem [thread:$0]  %s15_s11, 128, %s17_s13, [#allocation3], %s283_s17, %s283_s17, %s284_s18  }
   0x6   :  { %s285_s19 = smov [#allocation5]  }
   0x7   :  { %s29_s20 = sshll.u32 %s285_s19, 4  ;;  %s30_s20 = int_to_ptr.vmem [resolvable:$true] %s29_s20 }
   0x8   :  { %35 = dma.hbm_to_vmem [thread:$0]  %s28_s16, 1024, %s30_s20, [#allocation6], %s283_s17, %s283_s17, %s284_s18  }
   0x9   :  { %276 = dma.done.wait [#allocation3], 128  }
   0xa   :  { %277 = vsyncadd [#allocation3], 4294967168 }
   0xb   :  { %278 = dma.done.wait [#allocation6], 1024  }
   0xc   :  { %279 = vsyncadd [#allocation6], 4294966272  ;;  %v196_v0 = vld [vmem:[#allocation5 + $0x38] sm:$0xff]  ;;  %v195_v1 = vld [vmem:[#allocation5 + $0x30] sm:$0xff]  ;;  %s286_s0 = smov [#allocation7]   ;;  %s138_s23 = sshll.u32 %s315_s2, 4  ;;  %s139_s23 = int_to_ptr.hbm [resolvable:$true] %s138_s23 }
   0xd   :  { %116 = vmatpush.bf16.msra.mxu0 %v196_v0  ;;  %v194_v2 = vld [vmem:[#allocation5 + $0x28] sm:$0xff]  ;;  %v193_v3 = vld [vmem:[#allocation5 + $0x20] sm:$0xff]  ;;  %v192_v4 = vld [vmem:[#allocation5 + $0x18] sm:$0xff]  ;;  %s136_s1 = sshll.u32 %s286_s0, 4  ;;  %s287_s24 = smov 128   ;;  %s137_s1 = int_to_ptr.vmem [resolvable:$true] %s136_s1 }
   0xe   :  { %v191_v5 = vld [vmem:[#allocation5 + $0x10] sm:$0xff]  ;;  %v190_v6 = vld [vmem:[#allocation5 + $0x8] sm:$0xff]  ;;  %v189_v7 = vld [vmem:[#allocation5] sm:$0xff]  ;;  %s288_s25 = smov 8  }
   0xf   :  { %v188_v8 = vld [vmem:[#allocation2] sm:$0xff] }
  0x11   :  { %117 = vmatpush.bf16.msra.mxu0 %v195_v1 }
  0x15   :  { %118 = vmatpush.bf16.msra.mxu0 %v194_v2 }
  0x19   :  { %119 = vmatpush.bf16.msra.mxu0 %v193_v3 }
  0x1d   :  { %120 = vmatpush.bf16.msra.mxu0 %v192_v4 }
  0x21   :  { %121 = vmatpush.bf16.msra.mxu0 %v191_v5 }
  0x25   :  { %122 = vmatpush.bf16.msra.mxu0 %v190_v6 }
  0x29   :  { %123 = vmatpush.bf16.msra.mxu0 %v189_v7 }
  0x2c   :  { %124 = vmatmul.bf16.vlgmr.msra.gmra.mxu0 %v188_v8 }
  0xa9   :  { %v125_v9 = vpop.f32.mrf.mxu0 }
  0xaa   :  { %130 = vst [vmem:[#allocation7] sm:$0xff] %v125_v9 }
  0xb1   :  { %v127_v10 = vpop.f32.mrf.mxu0 }
  0xb2   :  { %131 = vst [vmem:[#allocation7 + $0x8] sm:$0xff] %v127_v10 }
  0xb3   :  { %144 = dma.vmem_to_hbm [thread:$0]  %s137_s1, 256, %s139_s23, [#allocation4], %s287_s24, %s287_s24, %s288_s25  }
  0xb4   :  { %280 = dma.done.wait [#allocation4], 256  }
  0xb5   :  { %281 = vsyncadd [#allocation4], 4294967040 }
  0xb6   :  { %149 = vsyncpa [#allocation3], 1 }
  0xb7   :  { %150 = vsyncpa [#allocation6], 1 }
  0xb8   :  { %151 = vsyncpa [#allocation4], 1 }

</bundles_post_ra>
